<compile_context>
chip_gen: v7x
topology: tpu7x:2x2x1
jax: 0.10.0
libtpu: 0.0.40
codegen_flags: <defaults>
</compile_context>

<pallas_src>
import functools

import jax
import jax.numpy as jnp
from jax.experimental import pallas as pl
from jax.experimental.pallas import tpu as pltpu

_LANES = 128


def _soft_dice_kernel(yp_ref, y_ref, out_ref, sum_p, sum_y, sum_i,
                      *, n_valid, block_rows, needs_mask):
    """Grid axis 0 walks row-chunks of the lane-dense (B, R, 128) view.

    yp_ref, y_ref     : (B, block_rows, 128) VMEM tiles (input dtype)
    out_ref           : (1, 1) f32 scalar loss (written on the last step)
    sum_p/sum_y/sum_i : (B, 128) f32 lane-wide accumulators (VMEM scratch)
    """
    c = pl.program_id(0)
    nc = pl.num_programs(0)

    @pl.when(c == 0)
    def _init():
        sum_p[...] = jnp.zeros_like(sum_p)
        sum_y[...] = jnp.zeros_like(sum_y)
        sum_i[...] = jnp.zeros_like(sum_i)

    yp = yp_ref[...].astype(jnp.float32)          # (B, TR, 128)
    yt = y_ref[...].astype(jnp.float32)
    p = jax.nn.sigmoid(yp)

    def _accumulate(pv, tv):
        # Per step reduce only the row (sublane) axis; the cross-lane reduce to
        # (B, 1) happens once in the finalize.
        sum_p[...] += jnp.sum(pv, axis=1)
        sum_y[...] += jnp.sum(tv, axis=1)
        sum_i[...] += jnp.sum(pv * tv, axis=1)

    if needs_mask:
        # Only the last chunk can contain lane-pad / partial-block elements.
        @pl.when(c < nc - 1)
        def _full():
            _accumulate(p, yt)

        @pl.when(c == nc - 1)
        def _tail():
            r = jax.lax.broadcasted_iota(jnp.int32, p.shape, 1)
            lane = jax.lax.broadcasted_iota(jnp.int32, p.shape, 2)
            eidx = (c * block_rows + r) * _LANES + lane
            keep = eidx < n_valid
            zero = jnp.zeros_like(p)
            _accumulate(jnp.where(keep, p, zero), jnp.where(keep, yt, zero))
    else:
        _accumulate(p, yt)

    @pl.when(c == nc - 1)
    def _finalize():
        smooth = jnp.float32(1.0)
        sp = jnp.sum(sum_p[...], axis=1, keepdims=True)          # (B, 1)
        sy = jnp.sum(sum_y[...], axis=1, keepdims=True)          # (B, 1)
        si = jnp.sum(sum_i[...], axis=1, keepdims=True)          # (B, 1)
        inter = jnp.sum(si, axis=0, keepdims=True)               # (1, 1) global
        score = (2.0 * inter + smooth) / (sp + sy + smooth)      # (B, 1)
        batch = jnp.float32(sp.shape[0])
        loss = 1.0 - jnp.sum(score, axis=0, keepdims=True) / batch
        out_ref[...] = loss.astype(out_ref.dtype)


@functools.partial(jax.jit, static_argnames=("target_block_bytes",))
def soft_dice_loss(y_pred, y, *, target_block_bytes=2 * 1024 * 1024):
    """Pallas implementation of SoftDiceLoss.forward(y_pred, y)."""
    assert y_pred.shape == y.shape
    b = y_pred.shape[0]
    yp = y_pred.reshape(b, -1)
    yt = y.reshape(b, -1)
    n = yp.shape[1]

    # Lane-dense view (B, R, 128).  The reshape is free when N % 128 == 0;
    # otherwise pad to the next lane multiple (padded elements are masked
    # inside the kernel, so the pad value is irrelevant).
    n128 = pl.cdiv(n, _LANES) * _LANES
    if n128 != n:
        # TODO(synk): this pad costs an extra HBM pass; prefer C*H*W % 128 == 0.
        yp = jnp.pad(yp, ((0, 0), (0, n128 - n)))
        yt = jnp.pad(yt, ((0, 0), (0, n128 - n)))
    rows = n128 // _LANES
    yp3 = yp.reshape(b, rows, _LANES)
    yt3 = yt.reshape(b, rows, _LANES)

    # Choose the row-chunk so each input tile is ~target_block_bytes.
    itemsize = yp3.dtype.itemsize
    rows_target = max(8, target_block_bytes // (b * _LANES * itemsize))
    if rows <= rows_target:
        block_rows = rows                       # full extent: always a legal block
    else:
        block_rows = max(8, (rows_target // 8) * 8)   # multiple of 8 sublanes
    n_chunks = pl.cdiv(rows, block_rows)
    needs_mask = (n_chunks * block_rows * _LANES) != n

    kernel = functools.partial(
        _soft_dice_kernel,
        n_valid=n,
        block_rows=block_rows,
        needs_mask=needs_mask,
    )

    out = pl.pallas_call(
        kernel,
        out_shape=jax.ShapeDtypeStruct((1, 1), jnp.float32),
        grid_spec=pltpu.PrefetchScalarGridSpec(
            num_scalar_prefetch=0,
            grid=(n_chunks,),
            in_specs=[
                pl.BlockSpec((b, block_rows, _LANES), lambda c: (0, c, 0)),
                pl.BlockSpec((b, block_rows, _LANES), lambda c: (0, c, 0)),
            ],
            out_specs=pl.BlockSpec((1, 1), lambda c: (0, 0)),
            scratch_shapes=[
                pltpu.VMEM((b, _LANES), jnp.float32),   # sum sigmoid(y_pred) per batch (lane-wide)
                pltpu.VMEM((b, _LANES), jnp.float32),   # sum y per batch (lane-wide)
                pltpu.VMEM((b, _LANES), jnp.float32),   # sum sigmoid(y_pred)*y per batch (lane-wide)
            ],
        ),
        compiler_params=pltpu.CompilerParams(
            dimension_semantics=("arbitrary",),   # reduction axis carried in scratch
        ),
    )(yp3, yt3)
    return out[0, 0]


def _soft_dice_loss_ref(y_pred, y):
    """Plain-JAX reference of the literal PyTorch forward."""
    smooth = 1.0
    b = y_pred.shape[0]
    yp = jax.nn.sigmoid(y_pred.reshape(b, -1).astype(jnp.float32))
    yt = y.reshape(b, -1).astype(jnp.float32)
    intersection = jnp.sum(yp * yt)                              # global scalar
    score = (2.0 * intersection + smooth) / (yp.sum(1) + yt.sum(1) + smooth)
    return 1.0 - jnp.sum(score) / b


if __name__ == "__main__":
    key = jax.random.PRNGKey(0)

    def _make(shape, k):
        k1, k2 = jax.random.split(k)
        y_pred = jax.random.normal(k1, shape, dtype=jnp.float32)              # logits
        y = (jax.random.uniform(k2, shape) > 0.5).astype(jnp.float32)         # binary mask
        return y_pred, y

    def _check(shape, k, **kw):
        y_pred, y = _make(shape, k)
        loss = soft_dice_loss(y_pred, y, **kw)
        jax.block_until_ready(loss)
        ref = _soft_dice_loss_ref(y_pred, y)
        assert jnp.allclose(loss, ref, rtol=1e-5, atol=1e-5), (shape, loss, ref)

    keys = jax.random.split(key, 4)

    # Main case: B=2, C=4, H=16, W=16 (N = 1024, single dense chunk, no mask).
    _check((2, 4, 16, 16), keys[0])
    # Multi-chunk accumulation path (tiny block target forces several grid steps).
    _check((2, 8, 16, 16), keys[1], target_block_bytes=8 * 1024)
    # Tail-mask path: N = 500 -> padded to 512 lanes, last chunk masked.
    _check((2, 5, 10, 10), keys[2])
    # Multi-chunk + partial last block + mask.
    _check((2, 9, 16, 16), keys[3], target_block_bytes=8 * 1024)

    print("KERNEL_OK")
</pallas_src>

<mosaic_0001>
module attributes {stable_mosaic.version = 11 : i64} {
  func.func @_soft_dice_kernel(%arg0: i32, %arg1: memref<2x8x128xf32, #tpu.memory_space<vmem>>, %arg2: memref<2x8x128xf32, #tpu.memory_space<vmem>>, %arg3: memref<1x1xf32, #tpu.memory_space<vmem>>, %arg4: memref<2x128xf32, #tpu.memory_space<vmem>>, %arg5: memref<2x128xf32, #tpu.memory_space<vmem>>, %arg6: memref<2x128xf32, #tpu.memory_space<vmem>>) attributes {dimension_semantics = [#tpu.dimension_semantics<arbitrary>], iteration_bounds = array<i64: 1>, scalar_prefetch = 0 : i64, scratch_operands = 3 : i64, tpu.core_type = #tpu.core_type<tc>, window_params = [{transform_indices = @transform_0, window_bounds = array<i64: 2, 8, 128>}, {transform_indices = @transform_1, window_bounds = array<i64: 2, 8, 128>}, {pipeline_mode = #tpu.pipeline_mode<synchronous>, transform_indices = @transform_2, window_bounds = array<i64: 1, 1>}]} {
    %c0_i32 = arith.constant 0 : i32
    %0 = arith.cmpi eq, %arg0, %c0_i32 : i32
    %1 = arith.extui %0 : i1 to i32
    %c0_i32_0 = arith.constant 0 : i32
    %2 = arith.cmpi ne, %1, %c0_i32_0 : i32
    scf.if %2 {
      %cst_23 = arith.constant 0.000000e+00 : f32
      %26 = vector.broadcast %cst_23 : f32 to vector<2x128xf32>
      %c0_24 = arith.constant 0 : index
      %c0_25 = arith.constant 0 : index
      %27 = vector.load %arg4[%c0_24, %c0_25] : memref<2x128xf32, #tpu.memory_space<vmem>>, vector<2x128xf32>
      tpu.vector_store %arg4[%c0_24, %c0_25], %26 {strides = array<i32>} : memref<2x128xf32, #tpu.memory_space<vmem>>, vector<2x128xf32>,
      %cst_26 = arith.constant 0.000000e+00 : f32
      %28 = vector.broadcast %cst_26 : f32 to vector<2x128xf32>
      %c0_27 = arith.constant 0 : index
      %c0_28 = arith.constant 0 : index
      %29 = vector.load %arg5[%c0_27, %c0_28] : memref<2x128xf32, #tpu.memory_space<vmem>>, vector<2x128xf32>
      tpu.vector_store %arg5[%c0_27, %c0_28], %28 {strides = array<i32>} : memref<2x128xf32, #tpu.memory_space<vmem>>, vector<2x128xf32>,
      %cst_29 = arith.constant 0.000000e+00 : f32
      %30 = vector.broadcast %cst_29 : f32 to vector<2x128xf32>
      %c0_30 = arith.constant 0 : index
      %c0_31 = arith.constant 0 : index
      %31 = vector.load %arg6[%c0_30, %c0_31] : memref<2x128xf32, #tpu.memory_space<vmem>>, vector<2x128xf32>
      tpu.vector_store %arg6[%c0_30, %c0_31], %30 {strides = array<i32>} : memref<2x128xf32, #tpu.memory_space<vmem>>, vector<2x128xf32>,
    } else {
    }
    %c0 = arith.constant 0 : index
    %c0_1 = arith.constant 0 : index
    %c0_2 = arith.constant 0 : index
    %3 = vector.load %arg1[%c0, %c0_1, %c0_2] : memref<2x8x128xf32, #tpu.memory_space<vmem>>, vector<2x8x128xf32>
    %c0_3 = arith.constant 0 : index
    %c0_4 = arith.constant 0 : index
    %c0_5 = arith.constant 0 : index
    %4 = vector.load %arg2[%c0_3, %c0_4, %c0_5] : memref<2x8x128xf32, #tpu.memory_space<vmem>>, vector<2x8x128xf32>
    %5 = arith.negf %3 : vector<2x8x128xf32>
    %6 = math.exp %5 : vector<2x8x128xf32>
    %cst = arith.constant 1.000000e+00 : f32
    %7 = vector.broadcast %cst : f32 to vector<2x8x128xf32>
    %8 = arith.addf %7, %6 : vector<2x8x128xf32>
    %9 = arith.divf %7, %8 : vector<2x8x128xf32>
    %c0_6 = arith.constant 0 : index
    %c0_7 = arith.constant 0 : index
    %10 = vector.load %arg4[%c0_6, %c0_7] : memref<2x128xf32, #tpu.memory_space<vmem>>, vector<2x128xf32>
    %cst_8 = arith.constant dense<0.000000e+00> : vector<2x128xf32>
    %11 = vector.multi_reduction <add>, %9, %cst_8 [1] : vector<2x8x128xf32> to vector<2x128xf32>
    %12 = arith.addf %10, %11 : vector<2x128xf32>
    %c0_9 = arith.constant 0 : index
    %c0_10 = arith.constant 0 : index
    %13 = vector.load %arg4[%c0_9, %c0_10] : memref<2x128xf32, #tpu.memory_space<vmem>>, vector<2x128xf32>
    tpu.vector_store %arg4[%c0_9, %c0_10], %12 {strides = array<i32>} : memref<2x128xf32, #tpu.memory_space<vmem>>, vector<2x128xf32>,
    %c0_11 = arith.constant 0 : index
    %c0_12 = arith.constant 0 : index
    %14 = vector.load %arg5[%c0_11, %c0_12] : memref<2x128xf32, #tpu.memory_space<vmem>>, vector<2x128xf32>
    %cst_13 = arith.constant dense<0.000000e+00> : vector<2x128xf32>
    %15 = vector.multi_reduction <add>, %4, %cst_13 [1] : vector<2x8x128xf32> to vector<2x128xf32>
    %16 = arith.addf %14, %15 : vector<2x128xf32>
    %c0_14 = arith.constant 0 : index
    %c0_15 = arith.constant 0 : index
    %17 = vector.load %arg5[%c0_14, %c0_15] : memref<2x128xf32, #tpu.memory_space<vmem>>, vector<2x128xf32>
    tpu.vector_store %arg5[%c0_14, %c0_15], %16 {strides = array<i32>} : memref<2x128xf32, #tpu.memory_space<vmem>>, vector<2x128xf32>,
    %c0_16 = arith.constant 0 : index
    %c0_17 = arith.constant 0 : index
    %18 = vector.load %arg6[%c0_16, %c0_17] : memref<2x128xf32, #tpu.memory_space<vmem>>, vector<2x128xf32>
    %19 = arith.mulf %9, %4 : vector<2x8x128xf32>
    %cst_18 = arith.constant dense<0.000000e+00> : vector<2x128xf32>
    %20 = vector.multi_reduction <add>, %19, %cst_18 [1] : vector<2x8x128xf32> to vector<2x128xf32>
    %21 = arith.addf %18, %20 : vector<2x128xf32>
    %c0_19 = arith.constant 0 : index
    %c0_20 = arith.constant 0 : index
    %22 = vector.load %arg6[%c0_19, %c0_20] : memref<2x128xf32, #tpu.memory_space<vmem>>, vector<2x128xf32>
    tpu.vector_store %arg6[%c0_19, %c0_20], %21 {strides = array<i32>} : memref<2x128xf32, #tpu.memory_space<vmem>>, vector<2x128xf32>,
    %c0_i32_21 = arith.constant 0 : i32
    %23 = arith.cmpi eq, %arg0, %c0_i32_21 : i32
    %24 = arith.extui %23 : i1 to i32
    %c0_i32_22 = arith.constant 0 : i32
    %25 = arith.cmpi ne, %24, %c0_i32_22 : i32
    scf.if %25 {
      %c0_23 = arith.constant 0 : index
      %c0_24 = arith.constant 0 : index
      %26 = vector.load %arg4[%c0_23, %c0_24] : memref<2x128xf32, #tpu.memory_space<vmem>>, vector<2x128xf32>
      %cst_25 = arith.constant dense<0.000000e+00> : vector<2xf32>
      %27 = vector.multi_reduction <add>, %26, %cst_25 [1] : vector<2x128xf32> to vector<2xf32>
      %28 = vector.shape_cast %27 : vector<2xf32> to vector<2x1xf32>
      %c0_26 = arith.constant 0 : index
      %c0_27 = arith.constant 0 : index
      %29 = vector.load %arg5[%c0_26, %c0_27] : memref<2x128xf32, #tpu.memory_space<vmem>>, vector<2x128xf32>
      %cst_28 = arith.constant dense<0.000000e+00> : vector<2xf32>
      %30 = vector.multi_reduction <add>, %29, %cst_28 [1] : vector<2x128xf32> to vector<2xf32>
      %31 = vector.shape_cast %30 : vector<2xf32> to vector<2x1xf32>
      %c0_29 = arith.constant 0 : index
      %c0_30 = arith.constant 0 : index
      %32 = vector.load %arg6[%c0_29, %c0_30] : memref<2x128xf32, #tpu.memory_space<vmem>>, vector<2x128xf32>
      %cst_31 = arith.constant dense<0.000000e+00> : vector<2xf32>
      %33 = vector.multi_reduction <add>, %32, %cst_31 [1] : vector<2x128xf32> to vector<2xf32>
      %34 = vector.shape_cast %33 : vector<2xf32> to vector<2x1xf32>
      %cst_32 = arith.constant dense<0.000000e+00> : vector<1xf32>
      %35 = vector.multi_reduction <add>, %34, %cst_32 [0] : vector<2x1xf32> to vector<1xf32>
      %36 = vector.shape_cast %35 : vector<1xf32> to vector<1x1xf32>
      %cst_33 = arith.constant 2.000000e+00 : f32
      %37 = vector.broadcast %cst_33 : f32 to vector<1x1xf32>
      %38 = arith.mulf %37, %36 : vector<1x1xf32>
      %cst_34 = arith.constant 1.000000e+00 : f32
      %39 = vector.broadcast %cst_34 : f32 to vector<1x1xf32>
      %40 = arith.addf %38, %39 : vector<1x1xf32>
      %41 = arith.addf %28, %31 : vector<2x1xf32>
      %cst_35 = arith.constant 1.000000e+00 : f32
      %42 = vector.broadcast %cst_35 : f32 to vector<2x1xf32>
      %43 = arith.addf %41, %42 : vector<2x1xf32>
      %44 = vector.broadcast %40 : vector<1x1xf32> to vector<2x1xf32>
      %45 = arith.divf %44, %43 : vector<2x1xf32>
      %cst_36 = arith.constant dense<0.000000e+00> : vector<1xf32>
      %46 = vector.multi_reduction <add>, %45, %cst_36 [0] : vector<2x1xf32> to vector<1xf32>
      %47 = vector.shape_cast %46 : vector<1xf32> to vector<1x1xf32>
      %cst_37 = arith.constant 2.000000e+00 : f32
      %48 = vector.broadcast %cst_37 : f32 to vector<1x1xf32>
      %49 = arith.divf %47, %48 : vector<1x1xf32>
      %cst_38 = arith.constant 1.000000e+00 : f32
      %50 = vector.broadcast %cst_38 : f32 to vector<1x1xf32>
      %51 = arith.subf %50, %49 : vector<1x1xf32>
      %c0_39 = arith.constant 0 : index
      %c0_40 = arith.constant 0 : index
      %52 = vector.load %arg3[%c0_39, %c0_40] : memref<1x1xf32, #tpu.memory_space<vmem>>, vector<1x1xf32>
      tpu.vector_store %arg3[%c0_39, %c0_40], %51 {strides = array<i32>} : memref<1x1xf32, #tpu.memory_space<vmem>>, vector<1x1xf32>,
    } else {
    }
    return
  }
  func.func @transform_0(%arg0: i32) -> (i32, i32, i32) {
    %c0_i32 = arith.constant 0 : i32
    %c0_i32_0 = arith.constant 0 : i32
    %c0_i32_1 = arith.constant 0 : i32
    return %c0_i32, %arg0, %c0_i32_0 : i32, i32, i32
  }
  func.func @transform_1(%arg0: i32) -> (i32, i32, i32) {
    %c0_i32 = arith.constant 0 : i32
    %c0_i32_0 = arith.constant 0 : i32
    %c0_i32_1 = arith.constant 0 : i32
    return %c0_i32, %arg0, %c0_i32_0 : i32, i32, i32
  }
  func.func @transform_2(%arg0: i32) -> (i32, i32) {
    %c0_i32 = arith.constant 0 : i32
    %c0_i32_0 = arith.constant 0 : i32
    %c0_i32_1 = arith.constant 0 : i32
    return %c0_i32, %c0_i32_0 : i32, i32
  }
}

</mosaic_0001>

<bundles_post_ra>
// kernel: soft_dice_loss.1
= control target key start
LH: loop header
LB: loop body
LE: loop exit
PB: predicated region body
PF: predicated region fallthrough
CT: control target
= control target key end

     0   :  { %v188_v3 = vmov 0.0   ;;  %s237_s0 = inlined_call_operand.vmem [shape: f32[2,8,128], index: 0, kind: input, shape index: {}]   ;;  %s238_s1 = inlined_call_operand.vmem [shape: f32[2,8,128], index: 1, kind: input, shape index: {}]   ;;  %s239_s2 = inlined_call_operand.hbm [shape: f32[1,1], index: 2, kind: output, shape index: {}]  }
   0x1   :  { %v19_v0 = vld [vmem:[%s237_s0] sm:$0xff]  ;;  %v20_v1 = vld [vmem:[%s237_s0 + $0x8] sm:$0xff]  ;;  %18 = vst [vmem:[#allocation4] sm:$0x3] %v188_v3  ;;  %16 = vst [vmem:[#allocation2] sm:$0x3] %v188_v3 }
   0x2   :  { %v21_v2 = vld [vmem:[%s238_s1] sm:$0xff]  ;;  %v22_v4 = vld [vmem:[%s238_s1 + $0x8] sm:$0xff]  ;;  %v150_v5 = vmul.f32 -1.442695, %v19_v0  ;;  %v151_v6 = vmul.f32 -1.442695, %v20_v1 }
   0x3   :  { %17 = vst [vmem:[#allocation3] sm:$0x3] %v188_v3  ;;  %v56_v7 = vrot.slane %v21_v2, 4  ;;  %v62_v8 = vrot.slane %v22_v4, 4 }
   0x4   :  { %7 = vsyncpa [#allocation6], 0  ;;  %154 = vpow2.f32 %v150_v5  ;;  %vm50_vm0 = vcmask 1041409   ;;  %vm99_vm1 = vcmask 1041408   ;;  %s189_s0 = smov [#allocation5]   ;;  %vm134_vm2 = vcmask 0  }
   0x5   :  { %v57_v9 = vadd.f32 %v56_v7, %v21_v2  ;;  %156 = vpow2.f32 %v151_v6  ;;  %v63_v10 = vadd.f32 %v62_v8, %v22_v4  ;;  %s142_s1 = sshll.u32 %s189_s0, 4  ;;  %s143_s1 = int_to_ptr.vmem [resolvable:$true] %s142_s1 }
   0x6   :  { %s164_s17 = scalar_lea.vmem %s143_s1, 16  ;;  %s168_s18 = scalar_lea.vmem %s143_s1, 32 }
   0x7   :  { %v58_v11 = vrot.slane %v57_v9, 2  ;;  %v64_v12 = vrot.slane %v63_v10, 2  ;;  %p165_p0 = scmp.ne.s32.totalorder %s143_s1, %s164_s17  ;;  %p169_p1 = scmp.lt.s32.totalorder %s143_s1, %s143_s1 }
   0x8   :  { %v35_v53 = vld [vmem:[#allocation2] sm:$0x3]  ;;  %v74_v56 = vld [vmem:[#allocation4] sm:$0x3]  ;;  %p170_p2 = scmp.lt.s32.totalorder %s168_s18, %s164_s17 }
   0x9   :  { %v59_v13 = vadd.f32 %v58_v11, %v57_v9  ;;  %v65_v14 = vadd.f32 %v64_v12, %v63_v10 }
   0xa   :  { %v55_v18 = vld [vmem:[#allocation3] sm:$0x3]  ;;  %p171_p3 = por %p170_p2, %p169_p1 }
   0xb   :  { %v60_v15 = vrot.slane %v59_v13, 1  ;;  %v66_v16 = vrot.slane %v65_v14, 1 }
   0xc   :  { %p172_p4 = pnand %p171_p3, %p165_p0 }
   0xd   :  { %v61_v17 = vadd.f32 %v60_v15, %v59_v13  ;;  %v67_v19 = vadd.f32 %v66_v16, %v65_v14 }
   0xe   :  { %v155_v20 = vpop.eup %154 }
   0xf   :  { %v157_v21 = vpop.eup %156  ;;  %v29_v22 = vadd.f32 1.0, %v155_v20  ;;  %v70_v23 = vsel %vm50_vm0, %v67_v19, %v61_v17 }
  0x10   :  { %v30_v24 = vadd.f32 1.0, %v157_v21  ;;  %v72_v25 = vadd.f32 %v70_v23, %v55_v18 }
  0x11   :  { %158 = vrcp.f32 %v29_v22 }
  0x12   :  { %160 = vrcp.f32 %v30_v24  ;;  %73 = vst [vmem:[#allocation3] sm:$0x3] %v72_v25 }
  0x19   :  { %v103_v26 = vld [vmem:[#allocation3] sm:$0x3] }
  0x1a   :  { %v104_v27 = vsel %vm99_vm1, %v103_v26, 0.0 }
  0x1b   :  { %v159_v28 = vpop.eup %158  ;;  %105 = vadd.xlane.f32.xlu1 %v104_v27 }
  0x1c   :  { %v161_v29 = vpop.eup %160  ;;  %v75_v30 = vmul.f32 %v159_v28, %v21_v2  ;;  %v36_v31 = vrot.slane %v159_v28, 4 }
  0x1d   :  { %v76_v32 = vmul.f32 %v161_v29, %v22_v4  ;;  %v42_v33 = vrot.slane %v161_v29, 4 }
  0x1e   :  { %v77_v34 = vrot.slane %v75_v30, 4  ;;  %v37_v35 = vadd.f32 %v159_v28, %v36_v31 }
  0x1f   :  { %v83_v36 = vrot.slane %v76_v32, 4  ;;  %v43_v37 = vadd.f32 %v161_v29, %v42_v33 }
  0x20   :  { %v78_v38 = vadd.f32 %v77_v34, %v75_v30  ;;  %v38_v39 = vrot.slane %v37_v35, 2 }
  0x21   :  { %v84_v40 = vadd.f32 %v83_v36, %v76_v32  ;;  %v44_v41 = vrot.slane %v43_v37, 2 }
  0x22   :  { %v79_v42 = vrot.slane %v78_v38, 2  ;;  %v39_v43 = vadd.f32 %v38_v39, %v37_v35 }
  0x23   :  { %v85_v44 = vrot.slane %v84_v40, 2  ;;  %v45_v45 = vadd.f32 %v44_v41, %v43_v37 }
  0x24   :  { %v80_v46 = vadd.f32 %v79_v42, %v78_v38  ;;  %v40_v47 = vrot.slane %v39_v43, 1 }
  0x25   :  { %v86_v48 = vadd.f32 %v85_v44, %v84_v40  ;;  %v46_v49 = vrot.slane %v45_v45, 1 }
  0x26   :  { %v81_v50 = vrot.slane %v80_v46, 1  ;;  %v41_v51 = vadd.f32 %v40_v47, %v39_v43 }
  0x27   :  { %v87_v52 = vrot.slane %v86_v48, 1  ;;  %v47_v54 = vadd.f32 %v46_v49, %v45_v45 }
  0x28   :  { %v82_v55 = vadd.f32 %v81_v50, %v80_v46 }
  0x29   :  { %v88_v57 = vadd.f32 %v87_v52, %v86_v48  ;;  %v51_v58 = vsel %vm50_vm0, %v47_v54, %v41_v51 }
  0x2a   :  { %v53_v59 = vadd.f32 %v51_v58, %v35_v53 }
  0x2b   :  { %v91_v60 = vsel %vm50_vm0, %v88_v57, %v82_v55 }
  0x2c   :  { %v93_v61 = vadd.f32 %v91_v60, %v74_v56  ;;  %54 = vst [vmem:[#allocation2] sm:$0x3] %v53_v59 }
  0x2e   :  { %94 = vst [vmem:[#allocation4] sm:$0x3] %v93_v61 }
  0x33   :  { %v98_v63 = vld [vmem:[#allocation2] sm:$0x3] }
  0x34   :  { %v100_v1 = vsel %vm99_vm1, %v98_v63, 0.0 }
  0x35   :  { %v107_v62 = vld [vmem:[#allocation4] sm:$0x3] }
  0x36   :  { %v108_v0 = vsel %vm99_vm1, %v107_v62, 0.0 }
  0x37   :  { %109 = vadd.xlane.f32.xlu0 %v108_v0 }
  0x3b   :  { %101 = vadd.xlane.f32.xlu0 %v100_v1 }
  0xa8   :  { %v106_v5 = vpop.xlane.xlu1 %105 }
  0xc4   :  { %v110_v2 = vpop.xlane.xlu0 %109 }
  0xc5   :  { %v111_v3 = vsel %vm99_vm1, %v110_v2, 0.0 }
  0xc6   :  { %v112_v4 = vrot.slane %v111_v3, 4 }
  0xc8   :  { %v113_v6 = vadd.f32 %v112_v4, %v111_v3  ;;  %v102_v7 = vpop.xlane.xlu0 %101 }
  0xc9   :  { %v120_v8 = vadd.f32 %v106_v5, %v102_v7 }
  0xca   :  { %v114_v9 = vrot.slane %v113_v6, 2 }
  0xcb   :  { %v121_v10 = vadd.f32 1.0, %v120_v8 }
  0xcc   :  { %v115_v11 = vadd.f32 %v114_v9, %v113_v6 }
  0xcd   :  { %162 = vrcp.f32 %v121_v10 }
  0xce   :  { %v116_v12 = vrot.slane %v115_v11, 1 }
  0xd0   :  { %v117_v13 = vadd.f32 %v116_v12, %v115_v11 }
  0xd2   :  { %v118_v14 = vmul.f32 2.0, %v117_v13 }
  0xd4   :  { %v119_v15 = vadd.f32 1.0, %v118_v14 }
  0xd7   :  { %v163_v16 = vpop.eup %162 }
  0xd8   :  { %v123_v17 = vmul.f32 %v163_v16, %v119_v15 }
  0xda   :  { %v124_v18 = vsel %vm99_vm1, %v123_v17, 0.0 }
  0xdb   :  { %v125_v19 = vrot.slane %v124_v18, 4 }
  0xdd   :  { %v126_v20 = vadd.f32 %v125_v19, %v124_v18 }
  0xdf   :  { %v127_v21 = vrot.slane %v126_v20, 2 }
  0xe1   :  { %v128_v22 = vadd.f32 %v127_v21, %v126_v20 }
  0xe3   :  { %v129_v23 = vrot.slane %v128_v22, 1 }
  0xe5   :  { %v130_v24 = vadd.f32 %v129_v23, %v128_v22 }
  0xe7   :  { %v132_v25 = vmul.f32 0.5, %v130_v24 }
  0xe9   :  { %v133_v26 = vsub.f32 1.0, %v132_v25 }
  0xeb   :  { %135 = vst.msk [vmem:[#allocation5] sm:$0x1] %vm134_vm2, %v133_v26 }
  0xec   :  { %175 = shalt.err (!%p172_p4)
}
  0xed   :  { %s176_s21 = scalar_lea.hbm %s239_s2, 16 }
  0xee   :  { %p177_p5 = scmp.ne.s32.totalorder %s239_s2, %s176_s21  ;;  %p180_p6 = scmp.lt.u32.totalorder %s176_s21, %s239_s2 }
  0xf0   :  { %p182_p7 = pnand %p180_p6, %p177_p5 }
  0xf2   :  { %185 = shalt.err (!%p182_p7)
}
  0xf3   :  { %145 = dma.vmem_to_hbm [thread:$0]  %s143_s1, 16, %s239_s2, [#allocation6]  }
  0xf4   :  { %186 = dma.done.wait [#allocation6], 16  }
  0xf5   :  { %187 = vsyncadd [#allocation6], 4294967280 }
  0xf6   :  { %149 = vsyncpa [#allocation6], 1 }

</bundles_post_ra>
